<compile_context>
chip_gen: v7x
topology: tpu7x:2x2x1
jax: 0.10.0
libtpu: 0.0.40
codegen_flags: <defaults>
</compile_context>

<pallas_src>
import jax
import jax.numpy as jnp
from jax.experimental import pallas as pl
from jax.experimental.pallas import tpu as pltpu

ALPHA = 0.8
BETA = 200.0

_LANES = 128
_MAX_TILE_ROWS = 1024        # (1024, 128) f32 tile = 512 KiB per input stream
_NUM_SHARDS = 2              # leading "parallel" axis -> both TCs on v7x
_CLS_PAD_LOGIT = -1.0e4      # softplus(-1e4) == 0 in f32 -> padded BCE elems are exactly 0


def _round_up(x, m):
    return (x + m - 1) // m * m


def _cdiv(a, b):
    return (a + b - 1) // b


def _multitask_partial_kernel(yhat_ref, y_ref, logit_ref, tgt_ref, out_ref, acc_ref):
    """Accumulate per-lane partial sums for one shard.

    acc_ref row 0: per-lane sum of (yhat - y)^2
    acc_ref row 1: per-lane sum of BCE-with-logits elements
    """
    t = pl.program_id(1)

    @pl.when(t == 0)
    def _init():
        acc_ref[...] = jnp.zeros_like(acc_ref)

    # ---- regression branch: sum of squared error (upcast to f32) ----
    d = yhat_ref[...].astype(jnp.float32) - y_ref[...].astype(jnp.float32)
    ssq = jnp.sum(d * d, axis=0, keepdims=True)                       # (1, 128)

    # ---- classification branch: numerically stable BCE-with-logits ----
    x = logit_ref[...].astype(jnp.float32)
    z = tgt_ref[...].astype(jnp.float32)
    bce_elem = jnp.maximum(x, 0.0) - x * z + jnp.log1p(jnp.exp(-jnp.abs(x)))
    bce = jnp.sum(bce_elem, axis=0, keepdims=True)                    # (1, 128)

    acc_ref[...] += jnp.concatenate([ssq, bce], axis=0)               # (2, 128)

    @pl.when(t == pl.num_programs(1) - 1)
    def _finalize():
        out_ref[...] = acc_ref[...].reshape(out_ref.shape)


def _pad_to_rows(flat, total_rows, pad_value):
    n = flat.shape[0]
    target = total_rows * _LANES
    if target > n:
        flat = jnp.pad(flat, (0, target - n), constant_values=pad_value)
    return flat.reshape(total_rows, _LANES)


def multi_task_loss(yhat, y, logits, targets, *, alpha=ALPHA, beta=BETA):
    """Pallas implementation of MultiTaskLossWrapper.forward (classification=True)."""
    yhat_f = jnp.ravel(yhat)
    y_f = jnp.ravel(y)
    logit_f = jnp.ravel(logits)
    tgt_f = jnp.ravel(targets)

    n_reg = yhat_f.shape[0]
    n_cls = logit_f.shape[0]
    assert y_f.shape[0] == n_reg and tgt_f.shape[0] == n_cls

    # Lane-dense tiling: pad both tasks to the same (total_rows, 128) slab.
    rows = max(_cdiv(n_reg, _LANES), _cdiv(n_cls, _LANES), 1)
    tile_rows = min(_MAX_TILE_ROWS, _round_up(_cdiv(rows, _NUM_SHARDS), 8))
    tiles_per_shard = _cdiv(rows, _NUM_SHARDS * tile_rows)
    total_rows = _NUM_SHARDS * tiles_per_shard * tile_rows

    yhat2 = _pad_to_rows(yhat_f, total_rows, 0.0)              # pad -> diff == 0
    y2 = _pad_to_rows(y_f, total_rows, 0.0)
    logit2 = _pad_to_rows(logit_f, total_rows, _CLS_PAD_LOGIT)  # pad -> bce elem == 0
    tgt2 = _pad_to_rows(tgt_f, total_rows, 0.0)

    in_spec = pl.BlockSpec(
        (tile_rows, _LANES),
        lambda s, t: (s * tiles_per_shard + t, 0),
    )

    partials = pl.pallas_call(
        _multitask_partial_kernel,
        out_shape=jax.ShapeDtypeStruct((_NUM_SHARDS, 2, _LANES), jnp.float32),
        grid_spec=pltpu.PrefetchScalarGridSpec(
            num_scalar_prefetch=0,
            grid=(_NUM_SHARDS, tiles_per_shard),
            in_specs=[in_spec, in_spec, in_spec, in_spec],
            out_specs=pl.BlockSpec((1, 2, _LANES), lambda s, t: (s, 0, 0)),
            scratch_shapes=[pltpu.VMEM((2, _LANES), jnp.float32)],
        ),
        compiler_params=pltpu.CompilerParams(
            dimension_semantics=("parallel", "arbitrary"),
            vmem_limit_bytes=32 * 1024 * 1024,
        ),
    )(yhat2, y2, logit2, tgt2)

    # Tiny finalize in plain JAX: global sums, /N, sqrt, alpha/beta weighting.
    ssq_total = jnp.sum(partials[:, 0, :])
    bce_total = jnp.sum(partials[:, 1, :])
    rmse = jnp.sqrt(ssq_total / n_reg)
    bce = bce_total / n_cls
    # TODO(synk): the PyTorch module's .item() bookkeeping (last_loss/last_rmse/
    # last_bce) is host-side state with no kernel equivalent; rmse/bce are
    # available here if a caller wants them.
    return alpha * rmse + beta * (1.0 - alpha) * bce


def _reference_loss(yhat, y, logits, targets, alpha=ALPHA, beta=BETA):
    rmse = jnp.sqrt(jnp.mean((yhat - y) ** 2))
    bce = jnp.mean(
        jnp.maximum(logits, 0.0)
        - logits * targets
        + jnp.log1p(jnp.exp(-jnp.abs(logits)))
    )
    return alpha * rmse + beta * (1.0 - alpha) * bce


if __name__ == "__main__":
    key = jax.random.PRNGKey(0)
    k1, k2, k3, k4 = jax.random.split(key, 4)

    # Regression task: predicted weights vs. ground-truth weights.
    B, F = 8, 128
    yhat = jax.random.normal(k1, (B, F), dtype=jnp.float32)
    y = jax.random.normal(k2, (B, F), dtype=jnp.float32)

    # Classification task: logits vs. {0,1} targets.
    logits = jax.random.normal(k3, (B, F), dtype=jnp.float32)
    targets = (jax.random.uniform(k4, (B, F)) > 0.5).astype(jnp.float32)

    loss = multi_task_loss(yhat, y, logits, targets)
    loss = jax.block_until_ready(loss)

    ref = _reference_loss(yhat, y, logits, targets)
    assert jnp.allclose(loss, ref, rtol=1e-5, atol=1e-5), (loss, ref)

    print("KERNEL_OK")
</pallas_src>

<mosaic_0001>
module attributes {stable_mosaic.version = 11 : i64} {
  func.func @_multitask_partial_kernel(%arg0: i32, %arg1: i32, %arg2: memref<8x128xf32, #tpu.memory_space<vmem>>, %arg3: memref<8x128xf32, #tpu.memory_space<vmem>>, %arg4: memref<8x128xf32, #tpu.memory_space<vmem>>, %arg5: memref<8x128xf32, #tpu.memory_space<vmem>>, %arg6: memref<1x2x128xf32, #tpu.memory_space<vmem>>, %arg7: memref<2x128xf32, #tpu.memory_space<vmem>>) attributes {dimension_semantics = [#tpu.dimension_semantics<parallel>, #tpu.dimension_semantics<arbitrary>], iteration_bounds = array<i64: 2, 1>, scalar_prefetch = 0 : i64, scratch_operands = 1 : i64, tpu.core_type = #tpu.core_type<tc>, window_params = [{transform_indices = @transform_0, window_bounds = array<i64: 8, 128>}, {transform_indices = @transform_1, window_bounds = array<i64: 8, 128>}, {transform_indices = @transform_2, window_bounds = array<i64: 8, 128>}, {transform_indices = @transform_3, window_bounds = array<i64: 8, 128>}, {transform_indices = @transform_4, window_bounds = array<i64: 1, 2, 128>}]} {
    %c0_i32 = arith.constant 0 : i32
    %0 = arith.cmpi eq, %arg1, %c0_i32 : i32
    %1 = arith.extui %0 : i1 to i32
    %c0_i32_0 = arith.constant 0 : i32
    %2 = arith.cmpi ne, %1, %c0_i32_0 : i32
    scf.if %2 {
      %cst_17 = arith.constant 0.000000e+00 : f32
      %30 = vector.broadcast %cst_17 : f32 to vector<2x128xf32>
      %c0_18 = arith.constant 0 : index
      %c0_19 = arith.constant 0 : index
      %31 = vector.load %arg7[%c0_18, %c0_19] : memref<2x128xf32, #tpu.memory_space<vmem>>, vector<2x128xf32>
      tpu.vector_store %arg7[%c0_18, %c0_19], %30 {strides = array<i32>} : memref<2x128xf32, #tpu.memory_space<vmem>>, vector<2x128xf32>,
    } else {
    }
    %c0 = arith.constant 0 : index
    %c0_1 = arith.constant 0 : index
    %3 = vector.load %arg2[%c0, %c0_1] : memref<8x128xf32, #tpu.memory_space<vmem>>, vector<8x128xf32>
    %c0_2 = arith.constant 0 : index
    %c0_3 = arith.constant 0 : index
    %4 = vector.load %arg3[%c0_2, %c0_3] : memref<8x128xf32, #tpu.memory_space<vmem>>, vector<8x128xf32>
    %5 = arith.subf %3, %4 : vector<8x128xf32>
    %6 = arith.mulf %5, %5 : vector<8x128xf32>
    %cst = arith.constant dense<0.000000e+00> : vector<128xf32>
    %7 = vector.multi_reduction <add>, %6, %cst [0] : vector<8x128xf32> to vector<128xf32>
    %8 = vector.shape_cast %7 : vector<128xf32> to vector<1x128xf32>
    %c0_4 = arith.constant 0 : index
    %c0_5 = arith.constant 0 : index
    %9 = vector.load %arg4[%c0_4, %c0_5] : memref<8x128xf32, #tpu.memory_space<vmem>>, vector<8x128xf32>
    %c0_6 = arith.constant 0 : index
    %c0_7 = arith.constant 0 : index
    %10 = vector.load %arg5[%c0_6, %c0_7] : memref<8x128xf32, #tpu.memory_space<vmem>>, vector<8x128xf32>
    %cst_8 = arith.constant 0.000000e+00 : f32
    %11 = vector.broadcast %cst_8 : f32 to vector<8x128xf32>
    %12 = arith.maximumf %9, %11 : vector<8x128xf32>
    %13 = arith.mulf %9, %10 : vector<8x128xf32>
    %14 = arith.subf %12, %13 : vector<8x128xf32>
    %15 = math.absf %9 : vector<8x128xf32>
    %cst_9 = arith.constant 0.000000e+00 : f32
    %16 = vector.broadcast %cst_9 : f32 to vector<8x128xf32>
    %17 = arith.subf %16, %15 : vector<8x128xf32>
    %18 = math.exp %17 : vector<8x128xf32>
    %19 = math.log1p %18 : vector<8x128xf32>
    %20 = arith.addf %14, %19 : vector<8x128xf32>
    %cst_10 = arith.constant dense<0.000000e+00> : vector<128xf32>
    %21 = vector.multi_reduction <add>, %20, %cst_10 [0] : vector<8x128xf32> to vector<128xf32>
    %22 = vector.shape_cast %21 : vector<128xf32> to vector<1x128xf32>
    %c0_11 = arith.constant 0 : index
    %c0_12 = arith.constant 0 : index
    %23 = vector.load %arg7[%c0_11, %c0_12] : memref<2x128xf32, #tpu.memory_space<vmem>>, vector<2x128xf32>
    %24 = tpu.concatenate %8, %22 in 0 : vector<1x128xf32>, vector<1x128xf32> -> vector<2x128xf32>
    %25 = arith.addf %23, %24 : vector<2x128xf32>
    %c0_13 = arith.constant 0 : index
    %c0_14 = arith.constant 0 : index
    %26 = vector.load %arg7[%c0_13, %c0_14] : memref<2x128xf32, #tpu.memory_space<vmem>>, vector<2x128xf32>
    tpu.vector_store %arg7[%c0_13, %c0_14], %25 {strides = array<i32>} : memref<2x128xf32, #tpu.memory_space<vmem>>, vector<2x128xf32>,
    %c0_i32_15 = arith.constant 0 : i32
    %27 = arith.cmpi eq, %arg1, %c0_i32_15 : i32
    %28 = arith.extui %27 : i1 to i32
    %c0_i32_16 = arith.constant 0 : i32
    %29 = arith.cmpi ne, %28, %c0_i32_16 : i32
    scf.if %29 {
      %c0_17 = arith.constant 0 : index
      %c0_18 = arith.constant 0 : index
      %30 = vector.load %arg7[%c0_17, %c0_18] : memref<2x128xf32, #tpu.memory_space<vmem>>, vector<2x128xf32>
      %31 = vector.shape_cast %30 : vector<2x128xf32> to vector<1x2x128xf32>
      %c0_19 = arith.constant 0 : index
      %c0_20 = arith.constant 0 : index
      %c0_21 = arith.constant 0 : index
      %32 = vector.load %arg6[%c0_19, %c0_20, %c0_21] : memref<1x2x128xf32, #tpu.memory_space<vmem>>, vector<1x2x128xf32>
      tpu.vector_store %arg6[%c0_19, %c0_20, %c0_21], %31 {strides = array<i32>} : memref<1x2x128xf32, #tpu.memory_space<vmem>>, vector<1x2x128xf32>,
    } else {
    }
    return
  }
  func.func @transform_0(%arg0: i32, %arg1: i32) -> (i32, i32) {
    %c1_i32 = arith.constant 1 : i32
    %0 = arith.muli %arg0, %c1_i32 : i32
    %1 = arith.addi %0, %arg1 : i32
    %c0_i32 = arith.constant 0 : i32
    %c0_i32_0 = arith.constant 0 : i32
    return %1, %c0_i32 : i32, i32
  }
  func.func @transform_1(%arg0: i32, %arg1: i32) -> (i32, i32) {
    %c1_i32 = arith.constant 1 : i32
    %0 = arith.muli %arg0, %c1_i32 : i32
    %1 = arith.addi %0, %arg1 : i32
    %c0_i32 = arith.constant 0 : i32
    %c0_i32_0 = arith.constant 0 : i32
    return %1, %c0_i32 : i32, i32
  }
  func.func @transform_2(%arg0: i32, %arg1: i32) -> (i32, i32) {
    %c1_i32 = arith.constant 1 : i32
    %0 = arith.muli %arg0, %c1_i32 : i32
    %1 = arith.addi %0, %arg1 : i32
    %c0_i32 = arith.constant 0 : i32
    %c0_i32_0 = arith.constant 0 : i32
    return %1, %c0_i32 : i32, i32
  }
  func.func @transform_3(%arg0: i32, %arg1: i32) -> (i32, i32) {
    %c1_i32 = arith.constant 1 : i32
    %0 = arith.muli %arg0, %c1_i32 : i32
    %1 = arith.addi %0, %arg1 : i32
    %c0_i32 = arith.constant 0 : i32
    %c0_i32_0 = arith.constant 0 : i32
    return %1, %c0_i32 : i32, i32
  }
  func.func @transform_4(%arg0: i32, %arg1: i32) -> (i32, i32, i32) {
    %c0_i32 = arith.constant 0 : i32
    %c0_i32_0 = arith.constant 0 : i32
    %c0_i32_1 = arith.constant 0 : i32
    return %arg0, %c0_i32, %c0_i32_0 : i32, i32, i32
  }
}

</mosaic_0001>

<bundles_post_ra>
// kernel: tpu_custom_call.1
= control target key start
LH: loop header
LB: loop body
LE: loop exit
PB: predicated region body
PF: predicated region fallthrough
CT: control target
= control target key end

     0   :  { %s1203_s0 = inlined_call_operand.hbm [shape: f32[16,128], index: 0, kind: input, shape index: {}]   ;;  %s1204_s1 = inlined_call_operand.hbm [shape: f32[16,128], index: 1, kind: input, shape index: {}]   ;;  %s1205_s2 = inlined_call_operand.hbm [shape: f32[16,128], index: 2, kind: input, shape index: {}]   ;;  %s1206_s3 = inlined_call_operand.hbm [shape: f32[16,128], index: 3, kind: input, shape index: {}]   ;;  %s1207_s4 = inlined_call_operand.hbm [shape: f32[2,2,128], index: 4, kind: output, shape index: {}]  }
   0x1   :  { %1217 = sst [smem:[#allocation21_spill]] %s1204_s1 }
   0x2   :  { %9 = vsyncpa [#allocation4], 0 }
   0x3   :  { %11 = vsyncpa [#allocation4 + $0x1], 0 }
   0x4   :  { %12 = vsyncpa [#allocation7], 0 }
   0x5   :  { %14 = vsyncpa [#allocation7 + $0x1], 0 }
   0x6   :  { %15 = vsyncpa [#allocation10], 0 }
   0x7   :  { %17 = vsyncpa [#allocation10 + $0x1], 0 }
   0x8   :  { %18 = vsyncpa [#allocation5], 0 }
   0x9   :  { %20 = vsyncpa [#allocation5 + $0x1], 0  ;;  %s908_s15 = smov 0   ;;  %s910_s16 = smov 0  }
   0xa   :  { %s912_s17 = smov 0   ;;  %s914_s18 = smov 0  }
   0xb   :  { %s916_s19 = smov 0   ;;  %s918_s20 = smov 0  }
   0xc LB: > { %1218 = sst [smem:[#allocation16_spill]] %s863_s17  ;;  %s939_s21 = sadd.s32 4294967295, %s875_s20   ;;  %s875_s20 = sphi %s918_s20, %s26_s20   ;;  %s871_s19 = sphi %s916_s19, %s1244_s19   ;;  %s867_s18 = sphi %s914_s18, %s1243_s18   ;;  %s863_s17 = sphi %s912_s17, %s1242_s17   ;;  %s859_s16 = sphi %s910_s16, %s1246_s16   ;;  %s855_s15 = sphi %s908_s15, %s1245_s15  }
   0xd   : > { %1219 = sst [smem:[#allocation17_spill]] %s871_s19  ;;  %s562_s22 = sadd.s32 4294967294, %s875_s20  }
   0xe   : > { %1220 = sst [smem:[#allocation18_spill]] %s875_s20  ;;  %s38_s23 = sadd.s32 1, %s871_s19 }
   0xf   : > { %s47_s24 = sadd.s32 1, %s863_s17  ;;  %p40_p0 = scmp.ge.s32.totalorder %s38_s23, 2 }
  0x10   : > { %p54_p1 = scmp.ne.s32.totalorder %s863_s17, %s859_s16  ;;  %p55_p2 = scmp.eq.s32.totalorder %s875_s20, 0 }
  0x11   : > { %p60_p3 = scmp.ne.s32.totalorder %s859_s16, %s855_s15  ;;  %s1248_s23 = smov (%p40_p0, %s38_s23), 0 }
  0x12   : > { %1221 = sst [smem:[#allocation19_spill]] %s1248_s23  ;;  %p951_p4 = por %p55_p2, %p54_p1 }
  0x13   : > { %p61_p5 = scmp.eq.s32.totalorder %s939_s21, 0  ;;  %s44_s26 = ssub.s32 %s871_s19, %s1248_s23 }
  0x14   : > { %p168_p6 = scmp.eq.s32.totalorder %s939_s21, 1  ;;  %p45_p7 = scmp.eq.s32.totalorder %s44_s26, 0 }
  0x15   : > { %p959_p8 = por %p61_p5, %p60_p3  ;;  %p174_p10 = scmp.eq.s32.totalorder %s562_s22, 1 }
  0x16   : > { %p963_p9 = por %p168_p6, %p54_p1  ;;  %p610_p13 = scmp.lt.s32.totalorder %s875_s20, 2 }
  0x17   : > { %s1223_s27 = scalar_select %p959_p8, 1, 0 }
  0x18   : > { %s1224_s28 = scalar_select %p963_p9, 1, 0 }
  0x19   : > { %s968_s29 = scalar_select %p45_p7, %s863_s17, %s47_s24  }
  0x1a   : > { %p970_p11 = por %p174_p10, %p60_p3  ;;  %s977_s5 = sand.u32 1, %s863_s17  }
  0x1b   : > { %1225 = sst [smem:[#allocation20_spill]] %s968_s29  ;;  %s980_s6 = sshll.u32 %s977_s5, 3 }
  0x1c   : > { %s1226_s30 = scalar_select %p970_p11, 1, 0 }
  0x1d   : > { %s983_s7 = sshll.u32 %s871_s19, 7  ;;  %p987_p0 = pnand %p610_p13, %p951_p4 }
  0x1e   : > { %s213_s9 = sand.u32 1, %s875_s20   ;;  %s1228_s1 = sld [smem:[#allocation21_spill]] }
  0x1f   : > { %s1227_s8 = scalar_select %p987_p0, 1, 0 }
  0x20   : > { %s217_s13 = scalar_lea.vmem [#allocation6], %s980_s6  ;;  %s1003_s22 = scalar_lea.sflag [#allocation7], %s213_s9 }
  0x21   : > { %s225_s14 = sshll.u32 %s217_s13, 4  ;;  %p1009_p4 = pneg %p987_p0  ;;  %s1000_s14 = int_to_ptr.vmem [resolvable:$true] %s225_s14 }
  0x24   : > { %s996_s12 = scalar_lea.hbm %s1228_s1, %s983_s7  ;;  %s670_s11 = scalar_lea.hbm %s1228_s1, 256 }
  0x25   : > { %s665_s24 = scalar_lea.hbm %s996_s12, 128  ;;  %p671_p7 = scmp.lt.u32.totalorder %s996_s12, %s1228_s1 }
  0x26   : > { %p666_p3 = scmp.ne.s32.totalorder %s996_s12, %s665_s24  ;;  %p672_p10 = scmp.lt.u32.totalorder %s670_s11, %s665_s24 }
  0x27   : > { %p674_p12 = scmp.lt.u32.totalorder %s665_s24, %s996_s12 }
  0x28   : > { %p668_p5 = pnand %p1009_p4, %p666_p3  ;;  %p673_p13 = por %p672_p10, %p671_p7 }
  0x2a   : > { %p669_p6 = pneg %p668_p5  ;;  %p675_p1 = por %p674_p12, %p673_p13 }
  0x2c   : > { %p676_p2 = pnand %p675_p1, %p669_p6 }
  0x2e   : > { %679 = shalt.err (!%p676_p2)
}
  0x2f   : > { %s680_s9 = scalar_lea.vmem %s1000_s14, 128  ;;  %s877_s26 = smov [#allocation6]  }
  0x30   : > { %p681_p3 = scmp.ne.s32.totalorder %s1000_s14, %s680_s9  ;;  %s685_s10 = sshll.u32 %s877_s26, 4  ;;  %s686_s10 = int_to_ptr.vmem [resolvable:$false] %s685_s10 }
  0x31   : > { %s687_s23 = scalar_lea.vmem %s686_s10, 256  ;;  %p688_p9 = scmp.lt.s32.totalorder %s1000_s14, %s686_s10 }
  0x32   : > { %p683_p5 = pnand %p681_p3, %p1009_p4  ;;  %p689_p8 = scmp.lt.s32.totalorder %s687_s23, %s680_s9 }
  0x34   : > { %p684_p11 = pneg %p683_p5  ;;  %p690_p7 = por %p689_p8, %p688_p9 }
  0x36   : > { %p691_p10 = pnand %p690_p7, %p684_p11 }
  0x38   : > { %694 = shalt.err (!%p691_p10)
}
  0x39   : > { %599 = dma.hbm_to_vmem [thread:$0]  (!%p987_p0), %s996_s12, 128, %s1000_s14, %s1003_s22  }
  0x3a   : > { %p1230_p12 = scmp.lt.s32.totalorder %s875_s20, 3  ;;  %p1231_p1 = scmp.ge.s32.totalorder %s875_s20, 1 }
  0x3b   : > { %s1045_s9 = scalar_lea.hbm %s1203_s0, %s983_s7  ;;  %s198_s26 = scalar_lea.vmem [#allocation3], %s980_s6 }
  0x3c   : > { %p1037_p2 = pnand %p1231_p1, %p1230_p12  ;;  %s206_s10 = sshll.u32 %s198_s26, 4  ;;  %s1048_s10 = int_to_ptr.vmem [resolvable:$true] %s206_s10 }
  0x3d   : > { %s1054_s23 = scalar_lea.hbm %s1205_s2, %s983_s7  ;;  %s195_s1 = scalar_lea.sflag [#allocation4], %s977_s5 }
  0x3e   : > { %s1232_s24 = scalar_select %p1037_p2, 1, 0 }
  0x3f   : > { %s695_s19 = scalar_lea.hbm %s1045_s9, 128  ;;  %s700_s29 = scalar_lea.hbm %s1203_s0, 256 }
  0x40   : > { %p696_p8 = scmp.ne.s32.totalorder %s1045_s9, %s695_s19  ;;  %p701_p6 = scmp.lt.u32.totalorder %s1045_s9, %s1203_s0 }
  0x41   : > { %p702_p13 = scmp.lt.u32.totalorder %s700_s29, %s695_s19  ;;  %p704_p5 = scmp.lt.u32.totalorder %s695_s19, %s1045_s9 }
  0x42   : > { %p698_p9 = pnand %p696_p8, %p1009_p4 }
  0x43   : > { %p703_p3 = por %p702_p13, %p701_p6 }
  0x44   : > { %p699_p11 = pneg %p698_p9 }
  0x45   : > { %p705_p7 = por %p704_p5, %p703_p3 }
  0x47   : > { %p706_p10 = pnand %p705_p7, %p699_p11 }
  0x49   : > { %709 = shalt.err (!%p706_p10)
}
  0x4a   : > { %s710_s26 = scalar_lea.vmem %s1048_s10, 128  ;;  %s878_s12 = smov [#allocation3]  }
  0x4b   : > { %p711_p12 = scmp.ne.s32.totalorder %s1048_s10, %s710_s26  ;;  %s715_s14 = sshll.u32 %s878_s12, 4  ;;  %s716_s14 = int_to_ptr.vmem [resolvable:$false] %s715_s14 }
  0x4c   : > { %s717_s17 = scalar_lea.vmem %s716_s14, 256  ;;  %p718_p9 = scmp.lt.s32.totalorder %s1048_s10, %s716_s14 }
  0x4d   : > { %p713_p1 = pnand %p711_p12, %p1009_p4  ;;  %p719_p2 = scmp.lt.s32.totalorder %s717_s17, %s710_s26 }
  0x4f   : > { %p714_p8 = pneg %p713_p1  ;;  %p720_p6 = por %p719_p2, %p718_p9 }
  0x51   : > { %p721_p13 = pnand %p720_p6, %p714_p8 }
  0x53   : > { %724 = shalt.err (!%p721_p13)
}
  0x54   : > { %596 = dma.hbm_to_vmem [thread:$0]  (!%p987_p0), %s1045_s9, 128, %s1048_s10, %s195_s1  }
  0x55   : > { %s236_s19 = scalar_lea.vmem [#allocation8], %s980_s6  ;;  %s725_s29 = scalar_lea.hbm %s1054_s23, 128 }
  0x56   : > { %s244_s20 = sshll.u32 %s236_s19, 4  ;;  %p726_p11 = scmp.ne.s32.totalorder %s1054_s23, %s725_s29  ;;  %s245_s20 = int_to_ptr.vmem [resolvable:$true] %s244_s20 }
  0x57   : > { %s730_s26 = scalar_lea.hbm %s1205_s2, 256  ;;  %p731_p5 = scmp.lt.u32.totalorder %s1054_s23, %s1205_s2 }
  0x58   : > { %p728_p2 = pnand %p726_p11, %p1009_p4  ;;  %p732_p7 = scmp.lt.u32.totalorder %s730_s26, %s725_s29 }
  0x59   : > { %p734_p12 = scmp.lt.u32.totalorder %s725_s29, %s1054_s23 }
  0x5a   : > { %p729_p3 = pneg %p728_p2  ;;  %p733_p10 = por %p732_p7, %p731_p5 }
  0x5c   : > { %p735_p1 = por %p734_p12, %p733_p10 }
  0x5e   : > { %p736_p8 = pnand %p735_p1, %p729_p3 }
  0x60   : > { %739 = shalt.err (!%p736_p8)
}
  0x61   : > { %s740_s1 = scalar_lea.vmem %s245_s20, 128  ;;  %s879_s9 = smov [#allocation8]  }
  0x62   : > { %p741_p9 = scmp.ne.s32.totalorder %s245_s20, %s740_s1  ;;  %s745_s10 = sshll.u32 %s879_s9, 4  ;;  %s746_s10 = int_to_ptr.vmem [resolvable:$false] %s745_s10 }
  0x63   : > { %s747_s17 = scalar_lea.vmem %s746_s10, 256  ;;  %p748_p11 = scmp.lt.s32.totalorder %s245_s20, %s746_s10 }
  0x64   : > { %p743_p6 = pnand %p741_p9, %p1009_p4  ;;  %p749_p2 = scmp.lt.s32.totalorder %s747_s17, %s740_s1 }
  0x66   : > { %p744_p13 = pneg %p743_p6  ;;  %p750_p0 = por %p749_p2, %p748_p11 }
  0x68   : > { %p751_p5 = pnand %p750_p0, %p744_p13 }
  0x6a   : > { %754 = shalt.err (!%p751_p5)
}
  0x6b   : > { %p1233_p7 = scmp.ne.s32.totalorder %s1227_s8, 0  ;;  %s1101_s11 = scalar_lea.hbm %s1206_s3, %s983_s7 }
  0x6c   : > { %s255_s13 = scalar_lea.vmem [#allocation9], %s980_s6  ;;  %s252_s12 = scalar_lea.sflag [#allocation10], %s977_s5 }
  0x6d   : > { %602 = dma.hbm_to_vmem [thread:$0]  (!%p1233_p7), %s1054_s23, 128, %s245_s20, %s1003_s22  }
  0x6e   : > { %s263_s26 = sshll.u32 %s255_s13, 4  ;;  %s755_s14 = scalar_lea.hbm %s1101_s11, 128  ;;  %s264_s26 = int_to_ptr.vmem [resolvable:$true] %s263_s26 }
  0x6f   : > { %p756_p0 = scmp.ne.s32.totalorder %s1101_s11, %s755_s14  ;;  %s760_s23 = scalar_lea.hbm %s1206_s3, 256 }
  0x70   : > { %p761_p12 = scmp.lt.u32.totalorder %s1101_s11, %s1206_s3  ;;  %p762_p1 = scmp.lt.u32.totalorder %s760_s23, %s755_s14 }
  0x71   : > { %p758_p3 = pnand %p756_p0, %p1009_p4  ;;  %p764_p9 = scmp.lt.u32.totalorder %s755_s14, %s1101_s11 }
  0x72   : > { %p763_p8 = por %p762_p1, %p761_p12 }
  0x73   : > { %p759_p10 = pneg %p758_p3 }
  0x74   : > { %p765_p6 = por %p764_p9, %p763_p8 }
  0x76   : > { %p766_p13 = pnand %p765_p6, %p759_p10 }
  0x78   : > { %769 = shalt.err (!%p766_p13)
}
  0x79   : > { %s770_s5 = scalar_lea.vmem %s264_s26, 128  ;;  %s880_s6 = smov [#allocation9]  }
  0x7a   : > { %p771_p11 = scmp.ne.s32.totalorder %s264_s26, %s770_s5  ;;  %s775_s9 = sshll.u32 %s880_s6, 4  ;;  %s776_s9 = int_to_ptr.vmem [resolvable:$false] %s775_s9 }
  0x7b   : > { %s777_s10 = scalar_lea.vmem %s776_s9, 256  ;;  %p778_p0 = scmp.lt.s32.totalorder %s264_s26, %s776_s9 }
  0x7c   : > { %p773_p2 = pnand %p771_p11, %p1009_p4  ;;  %p779_p3 = scmp.lt.s32.totalorder %s777_s10, %s770_s5 }
  0x7e   : > { %p774_p5 = pneg %p773_p2  ;;  %p780_p7 = por %p779_p3, %p778_p0 }
  0x80   : > { %p781_p1 = pnand %p780_p7, %p774_p5 }
  0x82   : > { %784 = shalt.err (!%p781_p1)
}
  0x83   : > { %p1234_p12 = scmp.ne.s32.totalorder %s1227_s8, 0  ;;  %p1235_p10 = scmp.ne.s32.totalorder %s1232_s24, 0 }
  0x84   : > { %s1125_s25 = sand.u32 (!%p1235_p10), 1, %s859_s16   ;;  %p1236_p4 = scmp.ne.s32.totalorder (!%p1235_p10), %s1223_s27, 0 }
  0x85   : > { %605 = dma.hbm_to_vmem [thread:$0]  (!%p1234_p12), %s1101_s11, 128, %s264_s26, %s252_s12  }
  0x86   : > { %272 = sbr.rel (%p1235_p10) target bundleno = 221 (0xdd), region = 36  ;;  %s1128_s17 = sshll.u32 (!%p1235_p10), %s1125_s25, 3 }
  0x87   : > { %s275_s19 = scalar_lea.sflag (!%p1235_p10), [#allocation4], %s1125_s25  ;;  %s278_s29 = scalar_lea.vmem (!%p1235_p10), [#allocation3], %s1128_s17 }
  0x8d   : > { %838 = dma.done.wait (%p1236_p4), %s275_s19, 128  }
  0x8e   : > { %840 = vsyncadd (%p1236_p4), %s275_s19, 4294967168  ;;  %s283_s8 = sand.u32 1, %s939_s21   ;;  %s287_s11 = scalar_lea.vmem [#allocation6], %s1128_s17 }
  0x8f   : > { %s284_s24 = scalar_lea.sflag [#allocation7], %s283_s8 }
  0x90   : > { %842 = dma.done.wait (%p1236_p4), %s284_s24, 256  }
  0x91   : > { %844 = vsyncadd (%p1236_p4), %s284_s24, 4294967040  ;;  %s296_s13 = scalar_lea.vmem [#allocation8], %s1128_s17  ;;  %s302_s26 = scalar_lea.sflag [#allocation10], %s1125_s25 }
  0x92   : > { %s305_s12 = scalar_lea.vmem [#allocation9], %s1128_s17 }
  0x93   : > { %846 = dma.done.wait (%p1236_p4), %s302_s26, 128  }
  0x94   : > { %848 = vsyncadd (%p1236_p4), %s302_s26, 4294967168  ;;  %v881_v0 = vmov 0.0   ;;  %v364_v1 = vld [vmem:[%s296_s13] sm:$0xff]  ;;  %v355_v6 = vld [vmem:[%s287_s11] sm:$0xff]  ;;  %vm390_vm1 = vcmask 1040384   ;;  %s578_s21 = sshll.u32 %s1125_s25, 1 }
  0x95   : > { %353 = vst [vmem:[#allocation2] sm:$0x3] %v881_v0  ;;  %v369_v2 = vand.u32 2147483647, %v364_v1  ;;  %v354_v5 = vld [vmem:[%s278_s29] sm:$0xff]  ;;  %v365_v12 = vld [vmem:[%s305_s12] sm:$0xff] }
  0x96   : > { %v356_v7 = vsub.f32 %v354_v5, %v355_v6  ;;  %v366_v15 = vmax.f32 %v364_v1, 0.0  ;;  %v367_v16 = vmul.f32 %v365_v12, %v364_v1  ;;  %s344_s27 = scalar_lea.vmem [#allocation11], %s578_s21  ;;  %s580_s1 = sshll.u32 %s867_s18, 5 }
  0x97   : > { %v370_v3 = vsub.f32 0.0, %v369_v2  ;;  %s413_s14 = sshll.u32 %s344_s27, 4  ;;  %s1156_s20 = scalar_lea.hbm %s1207_s4, %s580_s1  ;;  %s1151_s14 = int_to_ptr.vmem [resolvable:$true] %s413_s14 }
  0x98   : > { %v357_v10 = vmul.f32 %v356_v7, %v356_v7  ;;  %v368_v21 = vsub.f32 %v366_v15, %v367_v16  ;;  %s400_s7 = scalar_lea.sflag [#allocation5], %s1125_s25  ;;  %s785_s5 = scalar_lea.vmem %s1151_s14, 32 }
  0x99   : > { %v371_v4 = vmul.f32 1.442695, %v370_v3  ;;  %p786_p7 = scmp.ne.s32.totalorder %s1151_s14, %s785_s5  ;;  %p1237_p8 = scmp.ne.s32.totalorder %s1224_s28, 0 }
  0x9a   : > { %v358_v13 = vrot.slane %v357_v10, 4  ;;  %s882_s6 = smov [#allocation11]  }
  0x9b   : > { %661 = vpow2.f32 %v371_v4  ;;  %p787_p9 = pnand %p786_p7, %p1237_p8  ;;  %s789_s18 = sshll.u32 %s882_s6, 4  ;;  %s790_s18 = int_to_ptr.vmem [resolvable:$false] %s789_s18 }
  0x9c   : > { %v359_v18 = vadd.f32 %v358_v13, %v357_v10  ;;  %v389_v35 = vld [vmem:[#allocation2] sm:$0x3]  ;;  %s791_s9 = scalar_lea.vmem %s790_s18, 64  ;;  %p792_p13 = scmp.lt.s32.totalorder %s1151_s14, %s790_s18 }
  0x9d   : > { %p788_p6 = pneg %p787_p9  ;;  %p793_p11 = scmp.lt.s32.totalorder %s791_s9, %s785_s5 }
  0x9e   : > { %v360_v23 = vrot.slane %v359_v18, 2 }
  0x9f   : > { %p794_p2 = por %p793_p11, %p792_p13 }
  0xa0   : > { %v361_v26 = vadd.f32 %v360_v23, %v359_v18 }
  0xa1   : > { %p795_p5 = pnand %p794_p2, %p788_p6 }
  0xa2   : > { %v362_v29 = vrot.slane %v361_v26, 1 }
  0xa4   : > { %v363_v32 = vadd.f32 %v362_v29, %v361_v26 }
  0xa5   : > { %v662_v8 = vpop.eup %661 }
  0xa6   : > { %v373_v9 = vadd.f32 1.0, %v662_v8  ;;  %v376_v11 = vmul.f32 -0.5, %v662_v8  ;;  %v379_v17 = vand.u32 2147483647, %v662_v8 }
  0xa8   : > { %663 = vlog2.f32 %v373_v9  ;;  %v377_v14 = vadd.f32 1.0, %v376_v11  ;;  %vm380_vm0 = vcmp.lt.f32.partialorder %v379_v17, 0.0004427343 }
  0xaa   : > { %v378_v19 = vmul.f32 %v662_v8, %v377_v14 }
  0xb2   : > { %v664_v20 = vpop.eup %663 }
  0xb3   : > { %v375_v22 = vmul.f32 0.6931472, %v664_v20 }
  0xb5   : > { %v381_v24 = vsel %vm380_vm0, %v378_v19, %v375_v22 }
  0xb6   : > { %v382_v25 = vadd.f32 %v381_v24, %v368_v21 }
  0xb8   : > { %v383_v27 = vrot.slane %v382_v25, 4 }
  0xba   : > { %v384_v28 = vadd.f32 %v383_v27, %v382_v25 }
  0xbc   : > { %v385_v30 = vrot.slane %v384_v28, 2 }
  0xbe   : > { %v386_v31 = vadd.f32 %v385_v30, %v384_v28 }
  0xc0   : > { %v387_v33 = vrot.slane %v386_v31, 1 }
  0xc2   : > { %v388_v34 = vadd.f32 %v387_v33, %v386_v31 }
  0xc4   : > { %v391_v36 = vsel %vm390_vm1, %v363_v32, %v388_v34 }
  0xc5   : > { %v392_v37 = vadd.f32 %v391_v36, %v389_v35 }
  0xc7   : > { %393 = vst [vmem:[#allocation2] sm:$0x3] %v392_v37 }
  0xce   : > { %v397_v38 = vld [vmem:[#allocation2] sm:$0x3] }
  0xcf   : > { %398 = vst [vmem:[%s344_s27] sm:$0x3] %v397_v38 }
  0xd0   : > { %798 = shalt.err (!%p795_p5)
}
  0xd1   : > { %s799_s10 = scalar_lea.hbm %s1156_s20, 32  ;;  %s803_s19 = scalar_lea.hbm %s1207_s4, 64 }
  0xd2   : > { %p800_p0 = scmp.ne.s32.totalorder %s1156_s20, %s799_s10  ;;  %p804_p12 = scmp.lt.u32.totalorder %s1156_s20, %s1207_s4 }
  0xd3   : > { %p805_p10 = scmp.lt.u32.totalorder %s803_s19, %s799_s10  ;;  %p807_p7 = scmp.lt.u32.totalorder %s799_s10, %s1156_s20 }
  0xd4   : > { %p801_p3 = pnand %p800_p0, %p1237_p8 }
  0xd5   : > { %p806_p4 = por %p805_p10, %p804_p12 }
  0xd6   : > { %p802_p1 = pneg %p801_p3 }
  0xd7   : > { %p808_p9 = por %p807_p7, %p806_p4 }
  0xd9   : > { %p809_p6 = pnand %p808_p9, %p802_p1 }
  0xdb   : > { %812 = shalt.err (!%p809_p6)
}
  0xdc   : > { %591 = dma.vmem_to_hbm [thread:$0]  (%p1237_p8), %s1151_s14, 32, %s1156_s20, %s400_s7  }
  0xdd PF: > { %s1238_s24 = sld [smem:[#allocation18_spill]]  ;;  %s425_s11 = sand.u32 1, %s855_s15  }
  0xde   : > { %p1239_p13 = scmp.ne.s32.totalorder %s1226_s30, 0  ;;  %s426_s13 = scalar_lea.sflag [#allocation5], %s425_s11 }
  0xe3   : > { %p1240_p11 = scmp.ge.s32.totalorder %s1238_s24, 2 }
  0xe5   : > { %p607_p2 = pnand %p1240_p11, %p1239_p13 }
  0xe7   : > { %850 = dma.done.wait (!%p607_p2), %s426_s13, 32  }
  0xe8   : > { %852 = vsyncadd (!%p607_p2), %s426_s13, 4294967264  ;;  %s26_s20 = sadd.s32 1, %s1238_s24   ;;  %s1241_s26 = sld [smem:[#allocation16_spill]] }
  0xe9   : > { %p23_p5 = scmp.ge.s32.totalorder %s26_s20, 4   ;;  %s1242_s17 = sld [smem:[#allocation20_spill]] }
  0xea   : > { %s1243_s18 = sld [smem:[#allocation17_spill]]  ;;  %s1244_s19 = sld [smem:[#allocation19_spill]] }
  0xeb   : > { %s1245_s15 = smov %s859_s16  ;;  %25 = sbr.rel (!%p23_p5) target bundleno = 12 (0xc), region = 126 }
  0xee   : > { %s1246_s16 = smov %s1241_s26 }
  0xf2   :  { %431 = vsyncpa [#allocation4], 1 }
  0xf3   :  { %433 = vsyncpa [#allocation4 + $0x1], 1 }
  0xf4   :  { %434 = vsyncpa [#allocation7], 1 }
  0xf5   :  { %436 = vsyncpa [#allocation7 + $0x1], 1 }
  0xf6   :  { %437 = vsyncpa [#allocation10], 1 }
  0xf7   :  { %439 = vsyncpa [#allocation10 + $0x1], 1 }
  0xf8   :  { %440 = vsyncpa [#allocation5], 1 }
  0xf9   :  { %442 = vsyncpa [#allocation5 + $0x1], 1 }

</bundles_post_ra>
